<compile_context>
chip_gen: v7x
topology: tpu7x:2x2x1
jax: 0.10.0
libtpu: 0.0.40
codegen_flags: <defaults>
</compile_context>

<pallas_src>
import functools
from dataclasses import dataclass

import jax
import jax.numpy as jnp
from jax.experimental import pallas as pl
from jax.experimental.pallas import tpu as pltpu


# ---------------------------------------------------------------------------
# Kernel body
# ---------------------------------------------------------------------------
def _grouped_linear_kernel(x_ref, w_ref, *rest, has_bias, single_k_step):
    # Ref shapes (group dim squeezed out):
    #   x_ref: (tm, tk)  bf16 if pre-cast, else input dtype (cast on VPU below)
    #   w_ref: (tk, tn)  weight dtype
    #   b_ref: (1, tn)   weight dtype (only if has_bias)
    #   o_ref: (tm, tn)  weight dtype
    #   acc  : (tm, tn)  f32 scratch (only if K is split across the grid)
    if has_bias:
        b_ref = rest[0]
        rest = rest[1:]
    o_ref = rest[0]

    x = x_ref[...].astype(w_ref.dtype)   # no-op when x is already pre-cast

    if single_k_step:
        acc = jnp.dot(x, w_ref[...], preferred_element_type=jnp.float32)
        if has_bias:
            acc = acc + b_ref[...].astype(jnp.float32)
        o_ref[...] = acc.astype(o_ref.dtype)
    else:
        acc_ref = rest[1]
        k = pl.program_id(3)

        @pl.when(k == 0)
        def _():
            acc_ref[...] = jnp.zeros_like(acc_ref)

        acc_ref[...] += jnp.dot(x, w_ref[...], preferred_element_type=jnp.float32)

        @pl.when(k == pl.num_programs(3) - 1)
        def _():
            out = acc_ref[...]
            if has_bias:
                out = out + b_ref[...].astype(jnp.float32)
            o_ref[...] = out.astype(o_ref.dtype)


# ---------------------------------------------------------------------------
# Planning helpers
# ---------------------------------------------------------------------------
def _round_up(v, m):
    return ((v + m - 1) // m) * m


def _vmem_budget_bytes():
    cap = 64 * 1024 * 1024                      # conservative fallback (v7x)
    try:
        info = pltpu.get_tpu_info()
        cap = int(getattr(info, "vmem_capacity_bytes", cap)) or cap
    except Exception:
        pass
    # ~25% headroom for Mosaic internal scratch; never ask for more than 100 MiB.
    return min((cap * 3) // 4, 100 * 1024 * 1024)


def _plan_dim(dim, des, align):
    """Return (tile, padded_dim): tile divides padded_dim; tile is either the
    full extent (layout-exempt) or an aligned multiple."""
    des = max(align, (des // align) * align)
    if dim <= des:
        return dim, dim                          # full-extent block
    t = des
    while t >= align:                            # largest aligned divisor <= des
        if dim % t == 0:
            break
        t -= align
    else:
        t = 0
    if t >= max(align, des // 2):
        return t, dim
    return des, _round_up(dim, des)              # ragged: pad (masked off later)


def _vmem_bytes(tm, tn, tk, xb, wb, ob, *, has_bias, split_k, in_kernel_cast):
    v = 2 * tm * tk * xb            # double-buffered x tile
    v += 2 * tk * tn * wb           # double-buffered w tile
    v += 2 * tm * tn * ob           # double-buffered output tile
    v += tm * tn * 4                # f32 dot-result temporary
    if has_bias:
        v += 2 * tn * wb
    if split_k:
        v += tm * tn * 4            # f32 accumulator scratch
    if in_kernel_cast:
        v += tm * tk * wb           # bf16 cast temporary
    return v


# Large, roughly balanced tile candidates first (per-grid-step overhead is
# ~0.35us; big tiles amortize it and maximize operand residency).
_TILE_PAIRS = ((1024, 1024), (1024, 512), (512, 1024), (512, 512),
               (256, 512), (512, 256), (256, 256), (128, 256), (256, 128),
               (128, 128), (64, 128), (32, 128), (16, 128), (8, 128))
_TK_SPLITS = (4096, 2048, 1024, 512, 256, 128)


def _choose_tiles(M, K, N, xb, wb, ob, has_bias, budget, max_tk=None):
    """Pick (tm, tn, tk, Mp, Np, Kp); K kept fully resident whenever it fits."""
    # Stage 1: full-K resident (single pass over K; enables operand reuse).
    if max_tk is None or max_tk >= K:
        for tm_des, tn_des in _TILE_PAIRS:
            tm, Mp = _plan_dim(M, tm_des, 8)
            tn, Np = _plan_dim(N, tn_des, 128)
            if _vmem_bytes(tm, tn, K, xb, wb, ob, has_bias=has_bias,
                           split_k=False, in_kernel_cast=False) <= budget:
                return tm, tn, K, Mp, Np, K
    # Stage 2: split K (f32 accumulator path); keep tm/tn as large as possible
    # first since they set the re-read factors.
    for tm_des, tn_des in _TILE_PAIRS:
        tm, Mp = _plan_dim(M, tm_des, 8)
        tn, Np = _plan_dim(N, tn_des, 128)
        for tk_des in _TK_SPLITS:
            if tk_des >= K or (max_tk is not None and tk_des > max_tk):
                continue
            tk, Kp = _plan_dim(K, tk_des, 128)
            if _vmem_bytes(tm, tn, tk, xb, wb, ob, has_bias=has_bias,
                           split_k=True, in_kernel_cast=False) <= budget:
                return tm, tn, tk, Mp, Np, Kp
    # Last resort: minimum tiles.
    tm, Mp = _plan_dim(M, 8, 8)
    tn, Np = _plan_dim(N, 128, 128)
    tk, Kp = _plan_dim(K, 128, 128)
    return tm, tn, tk, Mp, Np, Kp


# ---------------------------------------------------------------------------
# Wrapper
# ---------------------------------------------------------------------------
def grouped_sliced_linear(x, w_stack, bias=None, *, max_tk=None):
    """Forward of GroupedSlicedLinear.

    x:       (G, M, K)  any float dtype (cast to weight dtype)
    w_stack: (G, K, N)  weight dtype (e.g. bf16)
    bias:    (G, 1, N)  weight dtype, or None
    returns  (G, M, N)  weight dtype
    max_tk:  optional cap on the K tile (testing knob; forces the split-K path)
    """
    G, M, K = x.shape
    Gw, Kw, N = w_stack.shape
    assert Gw == G and Kw == K, "x / w_stack shape mismatch"
    out_dtype = w_stack.dtype
    has_bias = bias is not None

    x_isz = jnp.dtype(x.dtype).itemsize
    w_isz = jnp.dtype(w_stack.dtype).itemsize
    o_isz = jnp.dtype(out_dtype).itemsize
    needs_cast = x.dtype != w_stack.dtype

    budget = int(_vmem_budget_bytes())
    xb_plan = w_isz if needs_cast else x_isz     # plan assuming x at weight width
    tm, tn, tk, Mp, Np, Kp = _choose_tiles(M, K, N, xb_plan, w_isz, o_isz,
                                           has_bias, budget, max_tk=max_tk)
    mt, nt, kt = Mp // tm, Np // tn, Kp // tk
    single_k = kt == 1

    # ---- nesting order & wrapper-side cast decision (byte-weighted) ---------
    def traffic(x_reads, w_reads):
        precast = needs_cast and x_reads > 1
        xb = w_isz if precast else x_isz
        t = x_reads * Mp * Kp * xb + w_reads * Kp * Np * w_isz + Mp * Np * o_isz
        if precast:
            t += Mp * Kp * (x_isz + w_isz)       # one-time wrapper cast pass
        if has_bias:
            t += Np * w_isz
        return G * t, precast

    if single_k:
        bytes_a, pre_a = traffic(nt, 1)          # A: n outer, m inner -> w resident
        bytes_b, pre_b = traffic(1, mt)          # B: m outer, n inner -> x resident
        if bytes_a <= bytes_b:
            order, hbm_bytes, precast = "A", bytes_a, pre_a
        else:
            order, hbm_bytes, precast = "B", bytes_b, pre_b
    else:
        order = "A"                              # both operands re-streamed anyway
        hbm_bytes, precast = traffic(nt, mt)

    # Keeping the in-kernel cast needs the wider x tile to still fit VMEM.
    if needs_cast and not precast:
        if _vmem_bytes(tm, tn, tk, x_isz, w_isz, o_isz, has_bias=has_bias,
                       split_k=not single_k, in_kernel_cast=True) > budget:
            precast = True

    x_in = x.astype(w_stack.dtype) if precast else x
    w_in = w_stack
    b_in = bias

    # ---- zero-pad ragged dims (matmul-neutral), slice the output back -------
    if (Mp, Kp) != (M, K):
        x_in = jnp.pad(x_in, ((0, 0), (0, Mp - M), (0, Kp - K)))
    if (Kp, Np) != (K, N):
        w_in = jnp.pad(w_in, ((0, 0), (0, Kp - K), (0, Np - N)))
    if has_bias and Np != N:
        b_in = jnp.pad(b_in, ((0, 0), (0, 0), (0, Np - N)))

    # ---- grid construction (k always last / "arbitrary") --------------------
    outer, inner = ("n", "m") if order == "A" else ("m", "n")
    counts = {"g": G, "m": mt, "n": nt, "k": kt}
    if G >= 2 and G % 2 == 0:
        axes = ("g", outer, inner, "k")
    elif counts[outer] >= 2 and counts[outer] % 2 == 0:
        axes = (outer, "g", inner, "k")          # v7x megacore: even leading axis
    else:
        axes = ("g", outer, inner, "k")
    grid = tuple(counts[a] for a in axes)
    pos = {a: i for i, a in enumerate(axes)}

    def imap(dims):
        return lambda a0, a1, a2, a3: tuple(
            0 if d is None else (a0, a1, a2, a3)[pos[d]] for d in dims)

    in_specs = [
        pl.BlockSpec((pl.Squeezed(), tm, tk), imap(("g", "m", "k"))),
        pl.BlockSpec((pl.Squeezed(), tk, tn), imap(("g", "k", "n"))),
    ]
    inputs = [x_in, w_in]
    if has_bias:
        in_specs.append(pl.BlockSpec((pl.Squeezed(), 1, tn), imap(("g", None, "n"))))
        inputs.append(b_in)
    out_spec = pl.BlockSpec((pl.Squeezed(), tm, tn), imap(("g", "m", "n")))
    scratch = [] if single_k else [pltpu.VMEM((tm, tn), jnp.float32)]

    cost = pl.CostEstimate(flops=2 * G * Mp * Kp * Np, transcendentals=0,
                           bytes_accessed=int(hbm_bytes))

    kernel = functools.partial(_grouped_linear_kernel,
                               has_bias=has_bias, single_k_step=single_k)

    out = pl.pallas_call(
        kernel,
        out_shape=jax.ShapeDtypeStruct((G, Mp, Np), out_dtype),
        grid_spec=pltpu.PrefetchScalarGridSpec(
            num_scalar_prefetch=0,
            grid=grid,
            in_specs=in_specs,
            out_specs=out_spec,
            scratch_shapes=scratch,
        ),
        compiler_params=pltpu.CompilerParams(
            dimension_semantics=("parallel", "parallel", "parallel", "arbitrary"),
            vmem_limit_bytes=budget,
        ),
        cost_estimate=cost,
    )(*inputs)

    if (Mp, Np) != (M, N):
        out = out[:, :M, :N]
    return out


# ---------------------------------------------------------------------------
# Module-equivalent wrapper
# ---------------------------------------------------------------------------
@dataclass
class Context:
    is_full: bool = True
    start_idx: int = 0
    end_idx: int = 0


class GroupedSlicedLinear:
    """JAX/Pallas equivalent of the PyTorch GroupedSlicedLinear module (forward)."""

    def __init__(self, context, n_layers, in_features, out_features,
                 dtype=jnp.bfloat16, bias=False, key=None):
        if key is None:
            key = jax.random.PRNGKey(0)
        keys = jax.random.split(key, n_layers)
        # Mirrors torch.randn(in_features, out_features) per layer.
        self.wg = jnp.stack([
            jax.random.normal(k, (in_features, out_features), dtype=jnp.float32)
            .astype(dtype) for k in keys
        ])  # (n_layers, in_features, out_features)
        self.bias = (jnp.zeros((n_layers, 1, out_features), dtype=dtype)
                     if bias else None)
        self.context = context

    def __call__(self, x):
        if self.context.is_full:
            w_use, b_use = self.wg, self.bias
        else:
            w_use = self.wg[self.context.start_idx:self.context.end_idx]
            b_use = (None if self.bias is None else
                     self.bias[self.context.start_idx:self.context.end_idx])
        return grouped_sliced_linear(x, w_use, b_use)


def _reference(x, w_stack, bias):
    """Pure-JAX reference with the same dtype semantics (x cast to bf16, f32 acc)."""
    xb = x.astype(w_stack.dtype).astype(jnp.float32)
    wf = w_stack.astype(jnp.float32)
    ref = jnp.einsum("gmk,gkn->gmn", xb, wf)
    if bias is not None:
        ref = ref + bias.astype(jnp.float32)
    return ref


if __name__ == "__main__":
    key = jax.random.PRNGKey(0)
    k1, k2, k3, k4 = jax.random.split(key, 4)

    # ---- Test 1: small demo shapes, with bias (full-K resident fast path) ----
    n_layers, M, in_features, out_features = 4, 8, 32, 32
    layer = GroupedSlicedLinear(Context(is_full=True), n_layers,
                                in_features, out_features,
                                dtype=jnp.bfloat16, bias=True, key=k1)
    x = jax.random.normal(k2, (n_layers, M, in_features), dtype=jnp.float32)
    out = jax.block_until_ready(layer(x))
    assert out.shape == (n_layers, M, out_features) and out.dtype == jnp.bfloat16
    ref = _reference(x, layer.wg, layer.bias)
    err = float(jnp.max(jnp.abs(out.astype(jnp.float32) - ref)))
    tol = 2e-2 * float(jnp.max(jnp.abs(ref))) + 1e-3
    assert err < tol, f"test1 max abs err {err} (tol {tol})"

    # ---- Test 2: split-K accumulator path (max_tk forces kt > 1) ------------
    G2, M2, K2, N2 = 2, 32, 256, 256
    x2 = jax.random.normal(k3, (G2, M2, K2), dtype=jnp.float32)
    w2 = jax.random.normal(k4, (G2, K2, N2), dtype=jnp.float32).astype(jnp.bfloat16)
    out2 = jax.block_until_ready(grouped_sliced_linear(x2, w2, None, max_tk=128))
    ref2 = _reference(x2, w2, None)
    err2 = float(jnp.max(jnp.abs(out2.astype(jnp.float32) - ref2)))
    tol2 = 2e-2 * float(jnp.max(jnp.abs(ref2))) + 1e-3
    assert out2.shape == (G2, M2, N2) and out2.dtype == jnp.bfloat16
    assert err2 < tol2, f"test2 max abs err {err2} (tol {tol2})"

    # ---- Test 3: ragged M (exercises the pad + slice path), with bias -------
    G3, M3, K3, N3 = 2, 1030, 32, 32
    k5, k6 = jax.random.split(k4)
    x3 = jax.random.normal(k5, (G3, M3, K3), dtype=jnp.float32)
    w3 = jax.random.normal(k6, (G3, K3, N3), dtype=jnp.float32).astype(jnp.bfloat16)
    b3 = jnp.full((G3, 1, N3), 0.5, dtype=jnp.bfloat16)
    out3 = jax.block_until_ready(grouped_sliced_linear(x3, w3, b3))
    ref3 = _reference(x3, w3, b3)
    err3 = float(jnp.max(jnp.abs(out3.astype(jnp.float32) - ref3)))
    tol3 = 2e-2 * float(jnp.max(jnp.abs(ref3))) + 1e-3
    assert out3.shape == (G3, M3, N3) and out3.dtype == jnp.bfloat16
    assert err3 < tol3, f"test3 max abs err {err3} (tol {tol3})"

    print("KERNEL_OK")
</pallas_src>

<mosaic_0001>
module attributes {stable_mosaic.version = 11 : i64} {
  func.func @_grouped_linear_kernel(%arg0: i32, %arg1: i32, %arg2: i32, %arg3: i32, %arg4: memref<1x8x32xf32, #tpu.memory_space<vmem>>, %arg5: memref<1x32x32xbf16, #tpu.memory_space<vmem>>, %arg6: memref<1x1x32xbf16, #tpu.memory_space<vmem>>, %arg7: memref<1x8x32xbf16, #tpu.memory_space<vmem>>) attributes {dimension_semantics = [#tpu.dimension_semantics<parallel>, #tpu.dimension_semantics<parallel>, #tpu.dimension_semantics<parallel>, #tpu.dimension_semantics<arbitrary>], iteration_bounds = array<i64: 4, 1, 1, 1>, scalar_prefetch = 0 : i64, scratch_operands = 0 : i64, tpu.core_type = #tpu.core_type<tc>, window_params = [{transform_indices = @transform_0, window_bounds = array<i64: 1, 8, 32>}, {transform_indices = @transform_1, window_bounds = array<i64: 1, 32, 32>}, {transform_indices = @transform_2, window_bounds = array<i64: 1, 1, 32>}, {transform_indices = @transform_3, window_bounds = array<i64: 1, 8, 32>}]} {
    %c0 = arith.constant 0 : index
    %c0_0 = arith.constant 0 : index
    %c0_1 = arith.constant 0 : index
    %0 = vector.load %arg4[%c0, %c0_0, %c0_1] : memref<1x8x32xf32, #tpu.memory_space<vmem>>, vector<1x8x32xf32>
    %1 = vector.shape_cast %0 : vector<1x8x32xf32> to vector<8x32xf32>
    %2 = arith.truncf %1 : vector<8x32xf32> to vector<8x32xbf16>
    %c0_2 = arith.constant 0 : index
    %c0_3 = arith.constant 0 : index
    %c0_4 = arith.constant 0 : index
    %3 = vector.load %arg5[%c0_2, %c0_3, %c0_4] : memref<1x32x32xbf16, #tpu.memory_space<vmem>>, vector<1x32x32xbf16>
    %4 = vector.shape_cast %3 : vector<1x32x32xbf16> to vector<32x32xbf16>
    %cst = arith.constant dense<0.000000e+00> : vector<8x32xf32>
    %5 = tpu.matmul %2, %4, %cst {dimension_numbers = #tpu.dot_dimension_numbers<[1], [0], [0], [1], [0, 0, 1, 1], [], []>} : vector<8x32xbf16>, vector<32x32xbf16>, vector<8x32xf32> -> vector<8x32xf32>
    %c0_5 = arith.constant 0 : index
    %c0_6 = arith.constant 0 : index
    %c0_7 = arith.constant 0 : index
    %6 = vector.load %arg6[%c0_5, %c0_6, %c0_7] : memref<1x1x32xbf16, #tpu.memory_space<vmem>>, vector<1x1x32xbf16>
    %7 = vector.shape_cast %6 : vector<1x1x32xbf16> to vector<1x32xbf16>
    %8 = arith.extf %7 : vector<1x32xbf16> to vector<1x32xf32>
    %9 = vector.broadcast %8 : vector<1x32xf32> to vector<8x32xf32>
    %10 = arith.addf %5, %9 : vector<8x32xf32>
    %11 = arith.truncf %10 : vector<8x32xf32> to vector<8x32xbf16>
    %c0_8 = arith.constant 0 : index
    %c0_9 = arith.constant 0 : index
    %c0_10 = arith.constant 0 : index
    %12 = vector.load %arg7[%c0_8, %c0_9, %c0_10] : memref<1x8x32xbf16, #tpu.memory_space<vmem>>, vector<1x8x32xbf16>
    %13 = vector.shape_cast %12 : vector<1x8x32xbf16> to vector<8x32xbf16>
    %14 = vector.shape_cast %11 : vector<8x32xbf16> to vector<1x8x32xbf16>
    tpu.vector_store %arg7[%c0_8, %c0_9, %c0_10], %14 {strides = array<i32>} : memref<1x8x32xbf16, #tpu.memory_space<vmem>>, vector<1x8x32xbf16>,
    return
  }
  func.func @transform_0(%arg0: i32, %arg1: i32, %arg2: i32, %arg3: i32) -> (i32, i32, i32) {
    %c0_i32 = arith.constant 0 : i32
    return %arg0, %arg2, %arg3 : i32, i32, i32
  }
  func.func @transform_1(%arg0: i32, %arg1: i32, %arg2: i32, %arg3: i32) -> (i32, i32, i32) {
    %c0_i32 = arith.constant 0 : i32
    return %arg0, %arg3, %arg1 : i32, i32, i32
  }
  func.func @transform_2(%arg0: i32, %arg1: i32, %arg2: i32, %arg3: i32) -> (i32, i32, i32) {
    %c0_i32 = arith.constant 0 : i32
    %c0_i32_0 = arith.constant 0 : i32
    return %arg0, %c0_i32, %arg1 : i32, i32, i32
  }
  func.func @transform_3(%arg0: i32, %arg1: i32, %arg2: i32, %arg3: i32) -> (i32, i32, i32) {
    %c0_i32 = arith.constant 0 : i32
    return %arg0, %arg2, %arg1 : i32, i32, i32
  }
}

</mosaic_0001>

<bundles_post_ra>
// kernel: tpu_custom_call.1
= control target key start
LH: loop header
LB: loop body
LE: loop exit
PB: predicated region body
PF: predicated region fallthrough
CT: control target
= control target key end

     0   :  { %8 = vsyncpa [#allocation3], 0  ;;  %s1014_s0 = inlined_call_operand.hbm [shape: f32[4,8,32], index: 0, kind: input, shape index: {}]   ;;  %s1015_s1 = inlined_call_operand.hbm [shape: bf16[4,32,32], index: 1, kind: input, shape index: {}]   ;;  %s1016_s2 = inlined_call_operand.vmem [shape: bf16[4,1,32], index: 2, kind: input, shape index: {}]   ;;  %s1017_s3 = inlined_call_operand.hbm [shape: bf16[4,8,32], index: 3, kind: output, shape index: {}]  }
   0x1   :  { %10 = vsyncpa [#allocation3 + $0x1], 0 }
   0x2   :  { %11 = vsyncpa [#allocation6], 0 }
   0x3   :  { %13 = vsyncpa [#allocation6 + $0x1], 0 }
   0x4   :  { %14 = vsyncpa [#allocation4], 0 }
   0x5   :  { %16 = vsyncpa [#allocation4 + $0x1], 0  ;;  %s787_s12 = smov 0   ;;  %s789_s13 = smov 0  }
   0x6   :  { %s791_s14 = smov 0   ;;  %s793_s15 = smov 0  }
   0x7   :  { %s795_s16 = smov 0   ;;  %s797_s17 = smov 0  }
   0x8 LB: > { %s507_s18 = sadd.s32 4294967295, %s758_s17   ;;  %s508_s19 = sadd.s32 4294967294, %s758_s17   ;;  %s758_s17 = sphi %s797_s17, %s22_s17   ;;  %s754_s16 = sphi %s795_s16, %s1035_s16   ;;  %s750_s15 = sphi %s793_s15, %s1034_s15   ;;  %s746_s14 = sphi %s791_s14, %s1033_s14   ;;  %s742_s13 = sphi %s789_s13, %s1032_s13   ;;  %s738_s12 = sphi %s787_s12, %s1031_s12  }
   0x9   : > { %s48_s20 = sadd.s32 1, %s754_s16  ;;  %s59_s21 = sadd.s32 1, %s746_s14 }
   0xa   : > { %p50_p0 = scmp.ge.s32.totalorder %s48_s20, 4  ;;  %p66_p1 = scmp.ne.s32.totalorder %s746_s14, %s742_s13 }
   0xb   : > { %p67_p2 = scmp.eq.s32.totalorder %s758_s17, 0  ;;  %p72_p3 = scmp.ne.s32.totalorder %s742_s13, %s738_s12 }
   0xc   : > { %s1037_s20 = smov (%p50_p0, %s48_s20), 0  ;;  %p73_p5 = scmp.eq.s32.totalorder %s507_s18, 0 }
   0xd   : > { %p828_p4 = por %p67_p2, %p66_p1  ;;  %s52_s23 = ssub.s32 %s754_s16, %s1037_s20 }
   0xe   : > { %p158_p6 = scmp.eq.s32.totalorder %s507_s18, 3  ;;  %p57_p7 = scmp.eq.s32.totalorder %s52_s23, 0 }
   0xf   : > { %p834_p8 = por %p73_p5, %p72_p3  ;;  %p164_p10 = scmp.eq.s32.totalorder %s508_s19, 3 }
  0x10   : > { %p838_p9 = por %p158_p6, %p66_p1  ;;  %p556_p12 = scmp.lt.s32.totalorder %s758_s17, 4 }
  0x11   : > { %s1021_s24 = scalar_select %p834_p8, 1, 0 }
  0x12   : > { %s1022_s25 = scalar_select %p838_p9, 1, 0 }
  0x13   : > { %s843_s26 = scalar_select %p57_p7, %s746_s14, %s59_s21  }
  0x14   : > { %p845_p11 = por %p164_p10, %p72_p3  ;;  %s851_s28 = sand.u32 1, %s746_s14  }
  0x15   : > { %s511_s29 = sshll.u32 %s851_s28, 3  ;;  %s512_s30 = sshll.u32 %s754_s16, 7 }
  0x16   : > { %s1023_s27 = scalar_select %p845_p11, 1, 0 }
  0x17   : > { %s858_s6 = scalar_lea.hbm %s1014_s0, %s512_s30  ;;  %s188_s7 = scalar_lea.vmem [#allocation2], %s511_s29 }
  0x18   : > { %s197_s8 = sshll.u32 %s188_s7, 4  ;;  %p864_p13 = pnand %p556_p12, %p828_p4  ;;  %s860_s8 = int_to_ptr.vmem [resolvable:$true] %s197_s8 }
  0x19   : > { %s185_s10 = scalar_lea.sflag [#allocation3], %s851_s28  ;;  %s612_s11 = scalar_lea.hbm %s858_s6, 128 }
  0x1a   : > { %p613_p2 = scmp.ne.s32.totalorder %s858_s6, %s612_s11  ;;  %p614_p3 = pneg %p864_p13 }
  0x1b   : > { %s617_s21 = scalar_lea.hbm %s1014_s0, 512  ;;  %p618_p4 = scmp.lt.u32.totalorder %s858_s6, %s1014_s0 }
  0x1c   : > { %p615_p5 = pnand %p614_p3, %p613_p2  ;;  %p619_p7 = scmp.lt.u32.totalorder %s617_s21, %s612_s11 }
  0x1d   : > { %p621_p12 = scmp.lt.u32.totalorder %s612_s11, %s858_s6 }
  0x1e   : > { %p616_p6 = pneg %p615_p5  ;;  %p620_p10 = por %p619_p7, %p618_p4 }
  0x20   : > { %p622_p0 = por %p621_p12, %p620_p10 }
  0x22   : > { %p623_p1 = pnand %p622_p0, %p616_p6 }
  0x24   : > { %626 = shalt.err (!%p623_p1)
}
  0x25   : > { %s627_s29 = scalar_lea.vmem %s860_s8, 128  ;;  %s760_s30 = smov [#allocation2]  }
  0x26   : > { %p628_p2 = scmp.ne.s32.totalorder %s860_s8, %s627_s29  ;;  %s632_s4 = sshll.u32 %s760_s30, 4  ;;  %s633_s4 = int_to_ptr.vmem [resolvable:$false] %s632_s4 }
  0x27   : > { %s634_s5 = scalar_lea.vmem %s633_s4, 256  ;;  %p635_p9 = scmp.lt.s32.totalorder %s860_s8, %s633_s4 }
  0x28   : > { %p630_p5 = pnand %p628_p2, %p614_p3  ;;  %p636_p4 = scmp.lt.s32.totalorder %s634_s5, %s627_s29 }
  0x2a   : > { %p631_p11 = pneg %p630_p5  ;;  %p637_p7 = por %p636_p4, %p635_p9 }
  0x2c   : > { %p638_p10 = pnand %p637_p7, %p631_p11 }
  0x2e   : > { %641 = shalt.err (!%p638_p10)
}
  0x2f   : > { %548 = dma.hbm_to_vmem [thread:$0]  (!%p864_p13), %s858_s6, 128, %s860_s8, %s185_s10  }
  0x30   : > { %p1025_p0 = scmp.lt.s32.totalorder %s758_s17, 5  ;;  %p1026_p1 = scmp.ge.s32.totalorder %s758_s17, 1 }
  0x31   : > { %s513_s11 = sshll.u32 %s851_s28, 4  ;;  %s527_s18 = sshll.u32 %s754_s16, 8 }
  0x32   : > { %p900_p6 = pnand %p1026_p1, %p1025_p0  ;;  %s909_s22 = scalar_lea.hbm %s1015_s1, %s527_s18 }
  0x33   : > { %s208_s23 = scalar_lea.vmem [#allocation5], %s513_s11  ;;  %s205_s6 = scalar_lea.sflag [#allocation6], %s851_s28 }
  0x34   : > { %s218_s29 = sshll.u32 %s208_s23, 4  ;;  %s642_s8 = scalar_lea.hbm %s909_s22, 256  ;;  %s911_s29 = int_to_ptr.vmem [resolvable:$true] %s218_s29 }
  0x35   : > { %p643_p9 = scmp.ne.s32.totalorder %s909_s22, %s642_s8  ;;  %s647_s4 = scalar_lea.hbm %s1015_s1, 1024 }
  0x36   : > { %p648_p2 = scmp.lt.u32.totalorder %s909_s22, %s1015_s1  ;;  %p649_p5 = scmp.lt.u32.totalorder %s647_s4, %s642_s8 }
  0x37   : > { %p645_p11 = pnand %p643_p9, %p614_p3  ;;  %p651_p7 = scmp.lt.u32.totalorder %s642_s8, %s909_s22 }
  0x38   : > { %p650_p4 = por %p649_p5, %p648_p2 }
  0x39   : > { %p646_p12 = pneg %p645_p11 }
  0x3a   : > { %p652_p10 = por %p651_p7, %p650_p4 }
  0x3c   : > { %p653_p0 = pnand %p652_p10, %p646_p12 }
  0x3e   : > { %656 = shalt.err (!%p653_p0)
}
  0x3f   : > { %s657_s11 = scalar_lea.vmem %s911_s29, 256  ;;  %s761_s19 = smov [#allocation5]  }
  0x40   : > { %p658_p1 = scmp.ne.s32.totalorder %s911_s29, %s657_s11  ;;  %s662_s21 = sshll.u32 %s761_s19, 4  ;;  %s663_s21 = int_to_ptr.vmem [resolvable:$false] %s662_s21 }
  0x41   : > { %s664_s23 = scalar_lea.vmem %s663_s21, 512  ;;  %p665_p8 = scmp.lt.s32.totalorder %s911_s29, %s663_s21 }
  0x42   : > { %p660_p9 = pnand %p658_p1, %p614_p3  ;;  %p666_p2 = scmp.lt.s32.totalorder %s664_s23, %s657_s11 }
  0x44   : > { %p661_p11 = pneg %p660_p9  ;;  %p667_p5 = por %p666_p2, %p665_p8 }
  0x46   : > { %p668_p4 = pnand %p667_p5, %p661_p11 }
  0x48   : > { %671 = shalt.err (!%p668_p4)
}
  0x49   : > { %s762_s8 = smov 64   ;;  %s763_s10 = smov 4  }
  0x4a   : > { %551 = dma.hbm_to_vmem [thread:$0]  (!%p864_p13), %s909_s22, 256, %s911_s29, %s205_s6, %s762_s8, %s762_s8, %s763_s10  }
  0x4b   : > { %239 = sbr.rel (%p900_p6) target bundleno = 325 (0x145), region = 32  ;;  %s942_s30 = sand.u32 (!%p900_p6), 1, %s742_s13  }
  0x4c   : > { %s517_s4 = sshll.u32 (!%p900_p6), %s942_s30, 3  ;;  %s242_s5 = scalar_lea.sflag (!%p900_p6), [#allocation3], %s942_s30 }
  0x4d   : > { %s245_s18 = scalar_lea.vmem (!%p900_p6), [#allocation2], %s517_s4  ;;  %p1028_p8 = scmp.ne.s32.totalorder (!%p900_p6), %s1021_s24, 0 }
  0x52   : > { %725 = dma.done.wait (%p1028_p8), %s242_s5, 128  }
  0x53   : > { %727 = vsyncadd (%p1028_p8), %s242_s5, 4294967168  ;;  %s518_s28 = sshll.u32 %s942_s30, 4  ;;  %s251_s9 = scalar_lea.sflag [#allocation6], %s942_s30 }
  0x54   : > { %s254_s7 = scalar_lea.vmem [#allocation5], %s518_s28 }
  0x55   : > { %729 = dma.done.wait (%p1028_p8), %s251_s9, 256  }
  0x56   : > { %731 = vsyncadd (%p1028_p8), %s251_s9, 4294967040  ;;  %v764_v0 = vmov 0.0   ;;  %vm765_vm0 = vmmov 0   ;;  %v610_v1 = vld [vmem:[%s254_s7] sm:$0xff]   ;;  %v611_v2 = vld [vmem:[%s254_s7 + $0x8] sm:$0xff]   ;;  %vm320_vm1 = vcmask 261120   ;;  %v304_v5 = vlaneseq }
  0x57   : > { %531 = vmatprep.subr.bf16.mxu0 %v764_v0  ;;  %535 = vmatprep.mubr.msk.bf16.mxu0 %vm765_vm0, %v764_v0  ;;  %v296_v3 = vld [vmem:[%s245_s18] sm:$0xff]  ;;  %p289_p13 = scmp.lt.s32.totalorder %s750_s15, 3  ;;  %s519_s11 = sshll.u32 %s942_s30, 2  ;;  %vm365_vm2 = vcmask 257024  }
  0x58   : > { %532 = vmatpush3.bf16.msra.mxu0 %v610_v1  ;;  %v297_v4 = vpack.c.bf16 %v296_v3, %v296_v3  ;;  %v305_v6 = vshrl.u32 %v304_v5, 7  ;;  %s524_s19 = sshll.u32 %s750_s15, 6  ;;  %s287_s21 = scalar_lea.vmem [#allocation7], %s519_s11 }
  0x59   : > { %533 = vmatprep.subr.bf16.mxu0 %v764_v0  ;;  %s290_s24 = scalar_select %p289_p13, %s750_s15, 3 }
  0x5a   : > { %v306_v9 = vsub.s32 0, %v305_v6  ;;  %s383_s23 = sshll.u32 %s287_s21, 4  ;;  %s966_s4 = scalar_lea.hbm %s1017_s3, %s524_s19  ;;  %s968_s23 = int_to_ptr.vmem [resolvable:$true] %s383_s23 }
  0x5b   : > { %s294_s6 = scalar_lea.vmem %s1016_s2, %s290_s24  ;;  %s368_s15 = scalar_lea.sflag [#allocation4], %s942_s30 }
  0x5c   : > { %534 = vmatpush3.bf16.msra.mxu0 %v611_v2  ;;  %v302_v7 = vld [vmem:[%s294_s6] sm:$0x1]  ;;  %s672_s5 = scalar_lea.vmem %s968_s23, 64  ;;  %p1029_p6 = scmp.ne.s32.totalorder %s1022_s25, 0 }
  0x5d   : > { %v303_v8 = vunpack.c.l.bf16 %v302_v7  ;;  %p673_p3 = scmp.ne.s32.totalorder %s968_s23, %s672_s5  ;;  %s766_s18 = smov [#allocation7]  }
  0x5e   : > { %s676_s28 = sshll.u32 %s766_s18, 4  ;;  %s677_s28 = int_to_ptr.vmem [resolvable:$false] %s676_s28 }
  0x5f   : > { %536 = vmatmul.mubr.msk.bf16.vlgmr.msra.gmra.mrb[0].mxu0 %vm320_vm1, %v297_v4  ;;  %v307_v10 = vrot.slane %v303_v8, %v306_v9  ;;  %p674_p12 = pnand %p673_p3, %p1029_p6  ;;  %s678_s9 = scalar_lea.vmem %s677_s28, 128 }
  0x60   : > { %p679_p10 = scmp.lt.s32.totalorder %s968_s23, %s677_s28  ;;  %p680_p0 = scmp.lt.s32.totalorder %s678_s9, %s672_s5 }
  0x61   : > { %p675_p7 = pneg %p674_p12 }
  0x62   : > { %p681_p1 = por %p680_p0, %p679_p10 }
  0x64   : > { %p682_p9 = pnand %p681_p1, %p675_p7 }
 0x132   : > { %v358_v11 = vpop.f32.mrb[0].mxu0 }
 0x133   : > { %v359_v12 = vadd.f32 %v358_v11, %v307_v10  ;;  %v537_v13 = vpop.f32.mrb[1].mxu0 }
 0x134   : > { %v361_v14 = vpop.f32.mrb[2].mxu0 }
 0x135   : > { %v364_v15 = vpack.c.bf16 %v359_v12, %v359_v12  ;;  %v538_v16 = vpop.f32.mrb[3].mxu0 }
 0x137   : > { %366 = vst.msk [vmem:[%s287_s21] sm:$0xf] %vm365_vm2, %v364_v15 }
 0x138   : > { %685 = shalt.err (!%p682_p9)
}
 0x139   : > { %s686_s30 = scalar_lea.hbm %s966_s4, 64  ;;  %s690_s22 = scalar_lea.hbm %s1017_s3, 256 }
 0x13a   : > { %p687_p11 = scmp.ne.s32.totalorder %s966_s4, %s686_s30  ;;  %p691_p4 = scmp.lt.u32.totalorder %s966_s4, %s1017_s3 }
 0x13b   : > { %p692_p8 = scmp.lt.u32.totalorder %s690_s22, %s686_s30  ;;  %p694_p3 = scmp.lt.u32.totalorder %s686_s30, %s966_s4 }
 0x13c   : > { %p688_p2 = pnand %p687_p11, %p1029_p6 }
 0x13d   : > { %p693_p13 = por %p692_p8, %p691_p4 }
 0x13e   : > { %p689_p5 = pneg %p688_p2 }
 0x13f   : > { %p695_p12 = por %p694_p3, %p693_p13 }
 0x141   : > { %p696_p7 = pnand %p695_p12, %p689_p5 }
 0x143   : > { %699 = shalt.err (!%p696_p7)
}
 0x144   : > { %543 = dma.vmem_to_hbm [thread:$0]  (%p1029_p6), %s968_s23, 64, %s966_s4, %s368_s15  }
 0x145 PF: > { %p557_p10 = scmp.ge.s32.totalorder %s758_s17, 2  ;;  %s395_s11 = sand.u32 1, %s738_s12  }
 0x146   : > { %p1030_p0 = scmp.ne.s32.totalorder %s1023_s27, 0  ;;  %s396_s19 = scalar_lea.sflag [#allocation4], %s395_s11 }
 0x148   : > { %p553_p1 = pnand %p557_p10, %p1030_p0 }
 0x14a   : > { %733 = dma.done.wait (!%p553_p1), %s396_s19, 64  }
 0x14b   : > { %735 = vsyncadd (!%p553_p1), %s396_s19, 4294967232  ;;  %s22_s17 = sadd.s32 1, %s758_s17   ;;  %s1031_s12 = smov %s742_s13 }
 0x14c   : > { %p19_p9 = scmp.ge.s32.totalorder %s22_s17, 6   ;;  %s1032_s13 = smov %s746_s14 }
 0x14d   : > { %s1033_s14 = smov %s843_s26  ;;  %s1034_s15 = smov %s754_s16 }
 0x14e   : > { %s1035_s16 = smov %s1037_s20  ;;  %21 = sbr.rel (!%p19_p9) target bundleno = 8 (0x8), region = 93 }
 0x155   :  { %401 = vsyncpa [#allocation3], 1 }
 0x156   :  { %403 = vsyncpa [#allocation3 + $0x1], 1 }
 0x157   :  { %404 = vsyncpa [#allocation6], 1 }
 0x158   :  { %406 = vsyncpa [#allocation6 + $0x1], 1 }
 0x159   :  { %407 = vsyncpa [#allocation4], 1 }
 0x15a   :  { %409 = vsyncpa [#allocation4 + $0x1], 1 }

</bundles_post_ra>
